<compile_context>
chip_gen: v7x
topology: tpu7x:2x2x1
jax: 0.10.0
libtpu: 0.0.40
codegen_flags: <defaults>
</compile_context>

<pallas_src>
import jax
import jax.numpy as jnp
from jax.experimental import pallas as pl
from jax.experimental.pallas import tpu as pltpu

_MXU_MIN_C = 16     # below this a CxC contraction cannot usefully feed the MXU
_MAX_BN = 8         # cap on batch folding (bounds kernel unrolling / DMA size)


def _vmem_capacity_bytes():
    """Per-core VMEM capacity; conservative default if the query fails."""
    try:
        return int(pltpu.get_tpu_info().vmem_capacity_bytes)
    except Exception:
        return 64 << 20     # v7x per-TensorCore capacity (smallest of the three)


def _residual_kernel(x_ref, w_ref, b_ref, o_ref):
    """One (batch-block, pixel-tile) grid step.

    x_ref : (BN, C, TM) activation tile; pixels on the lane axis.
    w_ref : (C, C)      1x1-conv weight (C_out, C_in), resident across grid.
    b_ref : (C, 1)      bias, f32, resident across grid.
    o_ref : (BN, C, TM) output tile.
    """
    bn, c, _ = x_ref.shape
    bias = b_ref[...]                                  # (C, 1), f32

    if c >= _MXU_MIN_C:
        # HBM-bound kernel: even a padded / underutilized MXU dot is free, so
        # switch to the systolic array as soon as C is non-trivial.
        w = w_ref[...]                                 # native dtype, resident
        for bi in range(bn):                           # bn is a small static int
            x = x_ref[bi]                              # (C, TM)
            acc = x.astype(jnp.float32) + bias         # residual + bias, f32
            acc = acc + jnp.dot(
                w, x,
                preferred_element_type=jnp.float32,
                precision=jax.lax.Precision.HIGHEST)   # full-fp32 fidelity
            o_ref[bi] = acc.astype(o_ref.dtype)
    else:
        # Truly tiny C (e.g. 4): unroll into C lane-parallel VPU multiply-adds
        # with pixels on lanes; weight-column broadcast sources hoisted out of
        # the multiply-add chain.
        w = w_ref[...].astype(jnp.float32)
        w_cols = [w[:, ci:ci + 1] for ci in range(c)]  # (C, 1) each
        xf = x_ref[...].astype(jnp.float32)            # (BN, C, TM)
        acc = xf + bias                                 # residual + bias, f32
        for ci in range(c):
            acc = acc + w_cols[ci] * xf[:, ci:ci + 1, :]
        o_ref[...] = acc.astype(o_ref.dtype)


def _residual_xla(x_nchw, w, b):
    """Fallback for tiny spatial layers (hw < 128): overhead-bound anyway."""
    y = jnp.einsum("oi,nihw->nohw",
                   w.astype(jnp.float32), x_nchw.astype(jnp.float32),
                   precision=jax.lax.Precision.HIGHEST)
    y = y + b.astype(jnp.float32)[None, :, None, None] + x_nchw.astype(jnp.float32)
    return y.astype(x_nchw.dtype)


def residual_1x1conv(x_nchw, w, b):
    """fn(x) + x with fn = 1x1 conv.  x: (N,C,H,W), w: (C_out,C_in), b: (C,)."""
    n, c, h, wd = x_nchw.shape
    hw = h * wd

    if hw < 128:
        # Last block dim < 128 would produce masked vst.msk partial stores
        # (<50% lane occupancy).  These 4x4/8x8 layers are tiny; let XLA do it.
        return _residual_xla(x_nchw, w, b)

    x3 = x_nchw.reshape(n, c, hw)            # free reshape, no transpose
    itemsize = jnp.dtype(x_nchw.dtype).itemsize

    # Generation-aware budgeting: ~1/8 of per-core VMEM per activation buffer,
    # capped at 8 MiB (past the grid-step-overhead knee even at 3.2 TB/s HBM).
    vmem_cap = _vmem_capacity_bytes()
    target_bytes = int(min(8 << 20, vmem_cap // 8))

    # Pixel-tile width: multiple of 128, or the full spatial extent.
    t = max(128, (target_bytes // max(1, c * itemsize)) // 128 * 128)
    if hw <= t:
        tile_hw = hw
        # Whole spatial extent fits one tile: fold batch images into one block
        # (fewer grid steps, larger contiguous DMAs), keeping >= 2 grid steps
        # when N >= 2 so both v7x TensorCores get work.
        bn = max(1, min(n, _MAX_BN,
                        target_bytes // max(1, c * hw * itemsize)))
        if n >= 2:
            bn = min(bn, pl.cdiv(n, 2))
    else:
        tile_hw = t
        bn = 1

    use_mxu = c >= _MXU_MIN_C
    # Prepare params once in the dtype the kernel consumes (no per-tile casts).
    w_k = w.astype(x_nchw.dtype if use_mxu else jnp.float32)
    b_k = b.astype(jnp.float32).reshape(c, 1)

    grid = (pl.cdiv(n, bn), pl.cdiv(hw, tile_hw))

    # VMEM: x + out tiles double-buffered, plus (double-buffered) resident params.
    tile_bytes = bn * c * tile_hw * itemsize
    param_bytes = w_k.size * w_k.dtype.itemsize + b_k.size * b_k.dtype.itemsize
    vmem_need = 4 * tile_bytes + 2 * param_bytes
    vmem_limit = int(min(max(2 * vmem_need, 16 << 20), (vmem_cap * 3) // 4))
    vmem_limit = max(vmem_limit, vmem_need)

    # NOTE: input_output_aliases={0: 0} (write in place over x) would remove the
    # extra HBM output allocation, but is only safe if x has no other consumers
    # and is not needed for autodiff, so it is intentionally left off.
    out3 = pl.pallas_call(
        _residual_kernel,
        out_shape=jax.ShapeDtypeStruct((n, c, hw), x_nchw.dtype),
        grid_spec=pltpu.PrefetchScalarGridSpec(
            num_scalar_prefetch=0,
            grid=grid,
            in_specs=[
                pl.BlockSpec((bn, c, tile_hw), lambda i, j: (i, 0, j)),  # x
                pl.BlockSpec((c, c), lambda i, j: (0, 0)),               # weight
                pl.BlockSpec((c, 1), lambda i, j: (0, 0)),               # bias
            ],
            out_specs=pl.BlockSpec((bn, c, tile_hw), lambda i, j: (i, 0, j)),
        ),
        compiler_params=pltpu.CompilerParams(
            dimension_semantics=("parallel", "parallel"),
            vmem_limit_bytes=vmem_limit,
        ),
    )(x3, w_k, b_k)

    return out3.reshape(n, c, h, wd)


if __name__ == "__main__":
    key = jax.random.PRNGKey(0)
    kx, kw, kb = jax.random.split(key, 3)

    N, C, H, W = 2, 4, 16, 16
    x = jax.random.normal(kx, (N, C, H, W), dtype=jnp.float32)

    # Deterministic parameters of the representative fn (1x1 conv, C -> C).
    w = jax.random.normal(kw, (C, C), dtype=jnp.float32) * (1.0 / jnp.sqrt(C))
    b = jax.random.normal(kb, (C,), dtype=jnp.float32) * 0.1

    out = jax.block_until_ready(residual_1x1conv(x, w, b))

    # Reference: fn(x) + x with fn = 1x1 conv (full-fp32 contraction).
    ref = (jnp.einsum("oi,nihw->nohw", w, x,
                      precision=jax.lax.Precision.HIGHEST)
           + b[None, :, None, None] + x)
    assert out.shape == x.shape
    assert jnp.allclose(out, ref, atol=1e-5, rtol=1e-5), "mismatch vs reference"

    print("KERNEL_OK")
</pallas_src>

<mosaic_0001>
module attributes {stable_mosaic.version = 11 : i64} {
  func.func @_residual_kernel(%arg0: i32, %arg1: i32, %arg2: memref<1x4x256xf32, #tpu.memory_space<vmem>>, %arg3: memref<4x4xf32, #tpu.memory_space<vmem>>, %arg4: memref<4x1xf32, #tpu.memory_space<vmem>>, %arg5: memref<1x4x256xf32, #tpu.memory_space<vmem>>) attributes {dimension_semantics = [#tpu.dimension_semantics<parallel>, #tpu.dimension_semantics<parallel>], iteration_bounds = array<i64: 2, 1>, scalar_prefetch = 0 : i64, scratch_operands = 0 : i64, tpu.core_type = #tpu.core_type<tc>, window_params = [{transform_indices = @transform_0, window_bounds = array<i64: 1, 4, 256>}, {pipeline_mode = #tpu.pipeline_mode<synchronous>, transform_indices = @transform_1, window_bounds = array<i64: 4, 4>}, {pipeline_mode = #tpu.pipeline_mode<synchronous>, transform_indices = @transform_2, window_bounds = array<i64: 4, 1>}, {transform_indices = @transform_3, window_bounds = array<i64: 1, 4, 256>}]} {
    %c0 = arith.constant 0 : index
    %c0_0 = arith.constant 0 : index
    %0 = vector.load %arg4[%c0, %c0_0] : memref<4x1xf32, #tpu.memory_space<vmem>>, vector<4x1xf32>
    %c0_1 = arith.constant 0 : index
    %c0_2 = arith.constant 0 : index
    %1 = vector.load %arg3[%c0_1, %c0_2] : memref<4x4xf32, #tpu.memory_space<vmem>>, vector<4x4xf32>
    %2 = vector.extract_strided_slice %1 {offsets = [0, 0], sizes = [4, 1], strides = [1, 1]} : vector<4x4xf32> to vector<4x1xf32>
    %3 = vector.extract_strided_slice %1 {offsets = [0, 1], sizes = [4, 1], strides = [1, 1]} : vector<4x4xf32> to vector<4x1xf32>
    %4 = vector.extract_strided_slice %1 {offsets = [0, 2], sizes = [4, 1], strides = [1, 1]} : vector<4x4xf32> to vector<4x1xf32>
    %5 = vector.extract_strided_slice %1 {offsets = [0, 3], sizes = [4, 1], strides = [1, 1]} : vector<4x4xf32> to vector<4x1xf32>
    %c0_3 = arith.constant 0 : index
    %c0_4 = arith.constant 0 : index
    %c0_5 = arith.constant 0 : index
    %6 = vector.load %arg2[%c0_3, %c0_4, %c0_5] : memref<1x4x256xf32, #tpu.memory_space<vmem>>, vector<1x4x256xf32>
    %7 = vector.shape_cast %0 : vector<4x1xf32> to vector<1x4x1xf32>
    %8 = vector.broadcast %7 : vector<1x4x1xf32> to vector<1x4x256xf32>
    %9 = arith.addf %6, %8 : vector<1x4x256xf32>
    %10 = vector.extract_strided_slice %6 {offsets = [0, 0, 0], sizes = [1, 1, 256], strides = [1, 1, 1]} : vector<1x4x256xf32> to vector<1x1x256xf32>
    %11 = vector.shape_cast %2 : vector<4x1xf32> to vector<1x4x1xf32>
    %12 = vector.broadcast %11 : vector<1x4x1xf32> to vector<1x4x256xf32>
    %13 = vector.broadcast %10 : vector<1x1x256xf32> to vector<1x4x256xf32>
    %14 = arith.mulf %12, %13 : vector<1x4x256xf32>
    %15 = arith.addf %9, %14 : vector<1x4x256xf32>
    %16 = vector.extract_strided_slice %6 {offsets = [0, 1, 0], sizes = [1, 1, 256], strides = [1, 1, 1]} : vector<1x4x256xf32> to vector<1x1x256xf32>
    %17 = vector.shape_cast %3 : vector<4x1xf32> to vector<1x4x1xf32>
    %18 = vector.broadcast %17 : vector<1x4x1xf32> to vector<1x4x256xf32>
    %19 = vector.broadcast %16 : vector<1x1x256xf32> to vector<1x4x256xf32>
    %20 = arith.mulf %18, %19 : vector<1x4x256xf32>
    %21 = arith.addf %15, %20 : vector<1x4x256xf32>
    %22 = vector.extract_strided_slice %6 {offsets = [0, 2, 0], sizes = [1, 1, 256], strides = [1, 1, 1]} : vector<1x4x256xf32> to vector<1x1x256xf32>
    %23 = vector.shape_cast %4 : vector<4x1xf32> to vector<1x4x1xf32>
    %24 = vector.broadcast %23 : vector<1x4x1xf32> to vector<1x4x256xf32>
    %25 = vector.broadcast %22 : vector<1x1x256xf32> to vector<1x4x256xf32>
    %26 = arith.mulf %24, %25 : vector<1x4x256xf32>
    %27 = arith.addf %21, %26 : vector<1x4x256xf32>
    %28 = vector.extract_strided_slice %6 {offsets = [0, 3, 0], sizes = [1, 1, 256], strides = [1, 1, 1]} : vector<1x4x256xf32> to vector<1x1x256xf32>
    %29 = vector.shape_cast %5 : vector<4x1xf32> to vector<1x4x1xf32>
    %30 = vector.broadcast %29 : vector<1x4x1xf32> to vector<1x4x256xf32>
    %31 = vector.broadcast %28 : vector<1x1x256xf32> to vector<1x4x256xf32>
    %32 = arith.mulf %30, %31 : vector<1x4x256xf32>
    %33 = arith.addf %27, %32 : vector<1x4x256xf32>
    %c0_6 = arith.constant 0 : index
    %c0_7 = arith.constant 0 : index
    %c0_8 = arith.constant 0 : index
    %34 = vector.load %arg5[%c0_6, %c0_7, %c0_8] : memref<1x4x256xf32, #tpu.memory_space<vmem>>, vector<1x4x256xf32>
    tpu.vector_store %arg5[%c0_6, %c0_7, %c0_8], %33 {strides = array<i32>} : memref<1x4x256xf32, #tpu.memory_space<vmem>>, vector<1x4x256xf32>,
    return
  }
  func.func @transform_0(%arg0: i32, %arg1: i32) -> (i32, i32, i32) {
    %c0_i32 = arith.constant 0 : i32
    %c0_i32_0 = arith.constant 0 : i32
    return %arg0, %c0_i32, %arg1 : i32, i32, i32
  }
  func.func @transform_1(%arg0: i32, %arg1: i32) -> (i32, i32) {
    %c0_i32 = arith.constant 0 : i32
    %c0_i32_0 = arith.constant 0 : i32
    %c0_i32_1 = arith.constant 0 : i32
    return %c0_i32, %c0_i32_0 : i32, i32
  }
  func.func @transform_2(%arg0: i32, %arg1: i32) -> (i32, i32) {
    %c0_i32 = arith.constant 0 : i32
    %c0_i32_0 = arith.constant 0 : i32
    %c0_i32_1 = arith.constant 0 : i32
    return %c0_i32, %c0_i32_0 : i32, i32
  }
  func.func @transform_3(%arg0: i32, %arg1: i32) -> (i32, i32, i32) {
    %c0_i32 = arith.constant 0 : i32
    %c0_i32_0 = arith.constant 0 : i32
    return %arg0, %c0_i32, %arg1 : i32, i32, i32
  }
}

</mosaic_0001>

<bundles_post_ra>
// kernel: tpu_custom_call.1
= control target key start
LH: loop header
LB: loop body
LE: loop exit
PB: predicated region body
PF: predicated region fallthrough
CT: control target
= control target key end

     0   :  { %8 = vsyncpa [#allocation3], 0  ;;  %s854_s0 = inlined_call_operand.hbm [shape: f32[2,4,256], index: 0, kind: input, shape index: {}]   ;;  %s855_s1 = inlined_call_operand.vmem [shape: f32[4,4], index: 1, kind: input, shape index: {}]   ;;  %s856_s2 = inlined_call_operand.vmem [shape: f32[4,1], index: 2, kind: input, shape index: {}]   ;;  %s857_s3 = inlined_call_operand.hbm [shape: f32[2,4,256], index: 3, kind: output, shape index: {}]  }
   0x1   :  { %10 = vsyncpa [#allocation3 + $0x1], 0 }
   0x2   :  { %11 = vsyncpa [#allocation4], 0 }
   0x3   :  { %13 = vsyncpa [#allocation4 + $0x1], 0  ;;  %s672_s12 = smov 0   ;;  %s674_s13 = smov 0  }
   0x4   :  { %s676_s14 = smov 0   ;;  %s678_s15 = smov 0  }
   0x5   :  { %s680_s16 = smov 0   ;;  %s682_s17 = smov 0  }
   0x6 LB: > { %s443_s18 = sadd.s32 4294967295, %s643_s17   ;;  %s444_s19 = sadd.s32 4294967294, %s643_s17   ;;  %s643_s17 = sphi %s682_s17, %s19_s17   ;;  %s639_s16 = sphi %s680_s16, %s873_s16   ;;  %s635_s15 = sphi %s678_s15, %s872_s15   ;;  %s631_s14 = sphi %s676_s14, %s871_s14   ;;  %s627_s13 = sphi %s674_s13, %s870_s13   ;;  %s623_s12 = sphi %s672_s12, %s869_s12  }
   0x7   : > { %s31_s20 = sadd.s32 1, %s639_s16  ;;  %s40_s21 = sadd.s32 1, %s631_s14 }
   0x8   : > { %p33_p0 = scmp.ge.s32.totalorder %s31_s20, 2  ;;  %p47_p1 = scmp.ne.s32.totalorder %s631_s14, %s627_s13 }
   0x9   : > { %p48_p2 = scmp.eq.s32.totalorder %s643_s17, 0  ;;  %p53_p3 = scmp.ne.s32.totalorder %s627_s13, %s623_s12 }
   0xa   : > { %s875_s20 = smov (%p33_p0, %s31_s20), 0  ;;  %p54_p5 = scmp.eq.s32.totalorder %s443_s18, 0 }
   0xb   : > { %p713_p4 = por %p48_p2, %p47_p1  ;;  %s35_s23 = ssub.s32 %s639_s16, %s875_s20 }
   0xc   : > { %p121_p6 = scmp.eq.s32.totalorder %s443_s18, 1  ;;  %p38_p7 = scmp.eq.s32.totalorder %s35_s23, 0 }
   0xd   : > { %p719_p8 = por %p54_p5, %p53_p3  ;;  %p127_p10 = scmp.eq.s32.totalorder %s444_s19, 1 }
   0xe   : > { %p723_p9 = por %p121_p6, %p47_p1  ;;  %p472_p13 = scmp.lt.s32.totalorder %s643_s17, 2 }
   0xf   : > { %s728_s26 = scalar_select %p38_p7, %s631_s14, %s40_s21  }
  0x10   : > { %s861_s25 = scalar_select %p723_p9, 1, 0 }
  0x11   : > { %p730_p11 = por %p127_p10, %p53_p3  ;;  %s153_s28 = sand.u32 1, %s631_s14  }
  0x12   : > { %s447_s29 = sshll.u32 %s153_s28, 3  ;;  %s458_s30 = sshll.u32 %s639_s16, 7 }
  0x13   : > { %s862_s27 = scalar_select %p730_p11, 1, 0 }
  0x14   : > { %s741_s6 = scalar_lea.hbm %s854_s0, %s458_s30  ;;  %s157_s7 = scalar_lea.vmem [#allocation2], %s447_s29 }
  0x15   : > { %s167_s8 = sshll.u32 %s157_s7, 4  ;;  %p747_p0 = pnand %p472_p13, %p713_p4  ;;  %s743_s8 = int_to_ptr.vmem [resolvable:$true] %s167_s8 }
  0x16   : > { %s154_s10 = scalar_lea.sflag [#allocation3], %s153_s28  ;;  %s531_s11 = scalar_lea.hbm %s741_s6, 128 }
  0x17   : > { %p532_p3 = scmp.ne.s32.totalorder %s741_s6, %s531_s11  ;;  %p533_p5 = pneg %p747_p0 }
  0x18   : > { %s536_s21 = scalar_lea.hbm %s854_s0, 256  ;;  %p537_p4 = scmp.lt.u32.totalorder %s741_s6, %s854_s0 }
  0x19   : > { %p534_p6 = pnand %p533_p5, %p532_p3  ;;  %p538_p10 = scmp.lt.u32.totalorder %s536_s21, %s531_s11 }
  0x1a   : > { %p540_p12 = scmp.lt.u32.totalorder %s531_s11, %s741_s6 }
  0x1b   : > { %p535_p7 = pneg %p534_p6  ;;  %p539_p13 = por %p538_p10, %p537_p4 }
  0x1d   : > { %p541_p1 = por %p540_p12, %p539_p13 }
  0x1f   : > { %p542_p2 = pnand %p541_p1, %p535_p7 }
  0x21   : > { %545 = shalt.err (!%p542_p2)
}
  0x22   : > { %s546_s28 = scalar_lea.vmem %s743_s8, 128  ;;  %s645_s29 = smov [#allocation2]  }
  0x23   : > { %p547_p3 = scmp.ne.s32.totalorder %s743_s8, %s546_s28  ;;  %s551_s30 = sshll.u32 %s645_s29, 4  ;;  %s552_s30 = int_to_ptr.vmem [resolvable:$false] %s551_s30 }
  0x24   : > { %s553_s4 = scalar_lea.vmem %s552_s30, 256  ;;  %p554_p9 = scmp.lt.s32.totalorder %s743_s8, %s552_s30 }
  0x25   : > { %p549_p6 = pnand %p547_p3, %p533_p5  ;;  %p555_p4 = scmp.lt.s32.totalorder %s553_s4, %s546_s28 }
  0x27   : > { %p550_p11 = pneg %p549_p6  ;;  %p556_p10 = por %p555_p4, %p554_p9 }
  0x29   : > { %p557_p12 = pnand %p556_p10, %p550_p11 }
  0x2b   : > { %560 = shalt.err (!%p557_p12)
}
  0x2c   : > { %467 = dma.hbm_to_vmem [thread:$0]  (!%p747_p0), %s741_s6, 128, %s743_s8, %s154_s10  }
  0x2d   : > { %p864_p1 = scmp.lt.s32.totalorder %s643_s17, 3  ;;  %p865_p2 = scmp.ge.s32.totalorder %s643_s17, 1 }
  0x2f   : > { %p173_p5 = pnand %p865_p2, %p864_p1 }
  0x30   : > { %s783_s5 = sand.u32 (!%p173_p5), 1, %s627_s13  }
  0x31   : > { %176 = sbr.rel (%p173_p5) target bundleno = 217 (0xd9), region = 32  ;;  %s451_s7 = sshll.u32 (!%p173_p5), %s783_s5, 3 }
  0x32   : > { %s179_s11 = scalar_lea.sflag (!%p173_p5), [#allocation3], %s783_s5  ;;  %s182_s9 = scalar_lea.vmem (!%p173_p5), [#allocation2], %s451_s7 }
  0x38   : > { %614 = dma.done.wait (%p719_p8), %s179_s11, 128  }
  0x39   : > { %616 = vsyncadd (%p719_p8), %s179_s11, 4294967168  ;;  %v646_v0 = vmov 0   ;;  %v647_v1 = vmov 1   ;;  %v207_v2 = vld [vmem:[%s856_s2] sm:$0xf]  ;;  %v648_v4 = vmov 2   ;;  %v217_v6 = vlaneseq }
  0x3a   : > { %527 = vset.pattern.permute.xlu0 %v646_v0  ;;  %528 = vset.pattern.permute.xlu1 %v647_v1  ;;  %v208_v3 = vld [vmem:[%s855_s1] sm:$0xf]  ;;  %v649_v5 = vmov 3   ;;  %v650_v8 = vmov 839922192   ;;  %s459_s24 = sshll.u32 %s635_s15, 7 }
  0x3b   : > { %212 = vperm.xlu0 %527, %v207_v2   ;;  %255 = vperm.xlu1 %528, %v208_v3   ;;  %v218_v7 = vshrl.u32 %v217_v6, 7  ;;  %v215_v9 = vunpack.c.l.s4 %v650_v8  ;;  %v209_v14 = vld [vmem:[%s182_s9] sm:$0xff]  ;;  %s204_s19 = scalar_lea.vmem [#allocation5], %s451_s7  ;;  %s805_s28 = scalar_lea.hbm %s857_s3, %s459_s24 }
  0x3c   : > { %s359_s21 = sshll.u32 %s204_s19, 4  ;;  %s343_s29 = scalar_lea.sflag [#allocation4], %s783_s5  ;;  %s807_s21 = int_to_ptr.vmem [resolvable:$true] %s359_s21 }
  0x3d   : > { %v260_v10 = vsub.s32 1, %v218_v7  ;;  %v264_v11 = vsub.s32 5, %v218_v7  ;;  %v231_v12 = vsub.s32 0, %v218_v7  ;;  %v235_v13 = vsub.s32 4, %v218_v7  ;;  %s561_s30 = scalar_lea.vmem %s807_s21, 128  ;;  %p866_p9 = scmp.ne.s32.totalorder %s861_s25, 0 }
  0x3e   : > { %v289_v15 = vsub.s32 2, %v218_v7  ;;  %v293_v16 = vsub.s32 6, %v218_v7  ;;  %v216_v17 = vunpack.c.0.s8 %v215_v9  ;;  %v318_v24 = vsub.s32 3, %v218_v7  ;;  %p562_p8 = scmp.ne.s32.totalorder %s807_s21, %s561_s30  ;;  %s651_s15 = smov [#allocation5]  }
  0x3f   : > { %225 = vperm.xlu0 %527, %v208_v3   ;;  %529 = vset.pattern.permute.xlu1 %v648_v4  ;;  %v261_v18 = vrot.slane %v209_v14, %v260_v10  ;;  %v265_v19 = vrot.slane %v209_v14, %v264_v11  ;;  %v232_v20 = vrot.slane %v209_v14, %v231_v12  ;;  %v322_v25 = vsub.s32 7, %v218_v7  ;;  %s565_s4 = sshll.u32 %s651_s15, 4  ;;  %s566_s4 = int_to_ptr.vmem [resolvable:$false] %s565_s4 }
  0x40   : > { %284 = vperm.xlu1 %529, %v208_v3   ;;  %v236_v21 = vrot.slane %v209_v14, %v235_v13  ;;  %v290_v22 = vrot.slane %v209_v14, %v289_v15  ;;  %v294_v23 = vrot.slane %v209_v14, %v293_v16  ;;  %v219_v26 = vsub.s32 %v216_v17, %v218_v7  ;;  %p563_p11 = pnand %p562_p8, %p866_p9  ;;  %s567_s7 = scalar_lea.vmem %s566_s4, 256 }
  0x41   : > { %v271_v29 = vrot.slane %v261_v18, %v260_v10  ;;  %v275_v30 = vrot.slane %v265_v19, %v260_v10  ;;  %v242_v31 = vrot.slane %v232_v20, %v231_v12  ;;  %v319_v35 = vrot.slane %v209_v14, %v318_v24  ;;  %p568_p7 = scmp.lt.s32.totalorder %s807_s21, %s566_s4  ;;  %p569_p13 = scmp.lt.s32.totalorder %s567_s7, %s561_s30 }
  0x42   : > { %v246_v32 = vrot.slane %v236_v21, %v231_v12  ;;  %v300_v33 = vrot.slane %v290_v22, %v289_v15  ;;  %v304_v34 = vrot.slane %v294_v23, %v289_v15  ;;  %v323_v36 = vrot.slane %v209_v14, %v322_v25  ;;  %p564_p0 = pneg %p563_p11 }
  0x43   : > { %530 = vset.pattern.permute.xlu0 %v649_v5  ;;  %v329_v46 = vrot.slane %v319_v35, %v318_v24  ;;  %p570_p3 = por %p569_p13, %p568_p7 }
  0x44   : > { %313 = vperm.xlu0 %530, %v208_v3   ;;  %v333_v47 = vrot.slane %v323_v36, %v318_v24 }
  0x45   : > { %p571_p6 = pnand %p570_p3, %p564_p0 }
  0xba   : > { %v213_v27 = vpop.permute.xlu0 %212  ;;  %v256_v28 = vpop.permute.xlu1 %255 }
  0xbb   : > { %v220_v37 = vrot.slane %v213_v27, %v219_v26  ;;  %v276_v39 = vmul.f32 %v271_v29, %v256_v28  ;;  %v277_v40 = vmul.f32 %v275_v30, %v256_v28 }
  0xbd   : > { %v222_v48 = vadd.f32 %v220_v37, %v209_v14  ;;  %v280_v50 = vcombine.low %v276_v39, %v277_v40 }
  0xbe   : > { %v226_v38 = vpop.permute.xlu0 %225 }
  0xbf   : > { %v247_v41 = vmul.f32 %v242_v31, %v226_v38  ;;  %v248_v42 = vmul.f32 %v246_v32, %v226_v38  ;;  %v285_v43 = vpop.permute.xlu1 %284 }
  0xc0   : > { %v305_v44 = vmul.f32 %v300_v33, %v285_v43  ;;  %v306_v45 = vmul.f32 %v304_v34, %v285_v43 }
  0xc1   : > { %v251_v49 = vcombine.low %v247_v41, %v248_v42 }
  0xc2   : > { %v309_v52 = vcombine.low %v305_v44, %v306_v45 }
  0xc3   : > { %v253_v51 = vadd.f32 %v251_v49, %v222_v48  ;;  %v314_v53 = vpop.permute.xlu0 %313 }
  0xc4   : > { %v334_v54 = vmul.f32 %v329_v46, %v314_v53  ;;  %v335_v55 = vmul.f32 %v333_v47, %v314_v53 }
  0xc5   : > { %v282_v56 = vadd.f32 %v280_v50, %v253_v51 }
  0xc6   : > { %v338_v57 = vcombine.low %v334_v54, %v335_v55 }
  0xc7   : > { %v311_v58 = vadd.f32 %v309_v52, %v282_v56 }
  0xc9   : > { %v340_v59 = vadd.f32 %v338_v57, %v311_v58 }
  0xcb   : > { %341 = vst [vmem:[%s204_s19] sm:$0xff] %v340_v59 }
  0xcc   : > { %574 = shalt.err (!%p571_p6)
}
  0xcd   : > { %s575_s5 = scalar_lea.hbm %s805_s28, 128  ;;  %s579_s6 = scalar_lea.hbm %s857_s3, 256 }
  0xce   : > { %p576_p4 = scmp.ne.s32.totalorder %s805_s28, %s575_s5  ;;  %p580_p1 = scmp.lt.u32.totalorder %s805_s28, %s857_s3 }
  0xcf   : > { %p581_p2 = scmp.lt.u32.totalorder %s579_s6, %s575_s5  ;;  %p583_p8 = scmp.lt.u32.totalorder %s575_s5, %s805_s28 }
  0xd0   : > { %p577_p10 = pnand %p576_p4, %p866_p9 }
  0xd1   : > { %p582_p5 = por %p581_p2, %p580_p1 }
  0xd2   : > { %p578_p12 = pneg %p577_p10 }
  0xd3   : > { %p584_p11 = por %p583_p8, %p582_p5 }
  0xd5   : > { %p585_p0 = pnand %p584_p11, %p578_p12 }
  0xd7   : > { %588 = shalt.err (!%p585_p0)
}
  0xd8   : > { %462 = dma.vmem_to_hbm [thread:$0]  (%p866_p9), %s807_s21, 128, %s805_s28, %s343_s29  }
  0xd9 PF: > { %s371_s18 = sand.u32 1, %s623_s12   ;;  %p867_p7 = scmp.ne.s32.totalorder %s862_s27, 0 }
  0xda   : > { %p868_p13 = scmp.ge.s32.totalorder %s643_s17, 2  ;;  %s372_s24 = scalar_lea.sflag [#allocation4], %s371_s18 }
  0xdc   : > { %p469_p3 = pnand %p868_p13, %p867_p7 }
  0xde   : > { %618 = dma.done.wait (!%p469_p3), %s372_s24, 128  }
  0xdf   : > { %620 = vsyncadd (!%p469_p3), %s372_s24, 4294967168  ;;  %s19_s17 = sadd.s32 1, %s643_s17   ;;  %s869_s12 = smov %s627_s13 }
  0xe0   : > { %p16_p6 = scmp.ge.s32.totalorder %s19_s17, 4   ;;  %s870_s13 = smov %s631_s14 }
  0xe1   : > { %s871_s14 = smov %s728_s26  ;;  %s872_s15 = smov %s639_s16 }
  0xe2   : > { %s873_s16 = smov %s875_s20  ;;  %18 = sbr.rel (!%p16_p6) target bundleno = 6 (0x6), region = 77 }
  0xe9   :  { %377 = vsyncpa [#allocation3], 1 }
  0xea   :  { %379 = vsyncpa [#allocation3 + $0x1], 1 }
  0xeb   :  { %380 = vsyncpa [#allocation4], 1 }
  0xec   :  { %382 = vsyncpa [#allocation4 + $0x1], 1 }

</bundles_post_ra>
